<compile_context>
chip_gen: v6e
topology: v6e:2x2x1
jax: 0.10.0
libtpu: 0.0.40
codegen_flags: <defaults>
</compile_context>

<pallas_src>
import jax
import jax.numpy as jnp
import numpy as np
from jax.experimental import pallas as pl
from jax.experimental.pallas import tpu as pltpu

EPS = 1e-5
TM_MAX = 1024            # max rows per M tile (review: 512-2048 on v5e/v6e)
_SINGLE_BUF = None       # lazily probed: pipeline_mode=pl.Buffered(1) support


# ---------------------------------------------------------------------------
# Hardware-aware sizing helpers
# ---------------------------------------------------------------------------
def _round_up(x, m):
    return (x + m - 1) // m * m


def _vmem_budget():
    """VMEM limit per generation: ~96 MiB on v5e/v6e (128 MiB physical VMEM),
    ~48 MiB on v7x (64 MiB VMEM per TensorCore)."""
    cap = 64 * 1024 * 1024
    try:
        cap = int(getattr(pltpu.get_tpu_info(), "vmem_capacity_bytes", cap))
    except Exception:
        pass
    return min((cap * 3) // 4, 100 * 1024 * 1024)


def _probe_single_buffer():
    """Check whether pipeline_mode=pl.Buffered(1) (single-buffered,
    grid-invariant operand) lowers and runs correctly on this jax/libtpu.
    Matters on v7x, where double-buffering the resident conv weights wastes
    several MiB of the 64 MiB VMEM; harmless elsewhere."""
    try:
        cspec = pl.BlockSpec((8, 128), lambda i: (0, 0),
                             pipeline_mode=pl.Buffered(1))

        def k(c_ref, x_ref, o_ref):
            o_ref[...] = x_ref[...] + c_ref[...]

        out = pl.pallas_call(
            k,
            grid=(2,),
            in_specs=[cspec, pl.BlockSpec((8, 128), lambda i: (i, 0))],
            out_specs=pl.BlockSpec((8, 128), lambda i: (i, 0)),
            out_shape=jax.ShapeDtypeStruct((16, 128), jnp.float32),
        )(jnp.ones((8, 128), jnp.float32), jnp.zeros((16, 128), jnp.float32))
        jax.block_until_ready(out)
        return bool(jnp.all(out == 1.0))
    except Exception:
        return False


def _single_buffer_ok():
    global _SINGLE_BUF
    if _SINGLE_BUF is None:
        _SINGLE_BUF = _probe_single_buffer()
    return _SINGLE_BUF


def _const_spec(block_shape):
    """BlockSpec for a grid-invariant operand (conv weights): single-buffer it
    when supported so the pipeline keeps only one resident copy."""
    if _single_buffer_ok():
        return pl.BlockSpec(block_shape, lambda i: (0, 0),
                            pipeline_mode=pl.Buffered(1))
    return pl.BlockSpec(block_shape, lambda i: (0, 0))


def _pick_tm(m, streamed_bytes_per_row, resident_bytes, vmem_limit, tm_max):
    """Largest power-of-two M tile whose double-buffered streaming operands
    plus resident weights fit the VMEM budget, clamped to the problem size."""
    tm = tm_max
    while tm > 128 and resident_bytes + 2 * tm * streamed_bytes_per_row > vmem_limit:
        tm //= 2
    return max(16, min(tm, _round_up(m, 16)))


def _cparams(vmem_limit):
    return pltpu.CompilerParams(
        dimension_semantics=("parallel",),
        vmem_limit_bytes=int(vmem_limit))


# ---------------------------------------------------------------------------
# Pallas kernels
# ---------------------------------------------------------------------------
def _col_stats(acc, sum_ref, sumsq_ref):
    # Per-tile column sum / sum-of-squares of the f32 matmul accumulator.
    # Broadcast across the 8-sublane output block (wrapper reads row 0).
    # (Low-priority review item: stat payload is 8x larger than needed, but
    # it is a negligible fraction of total HBM traffic.)
    s = jnp.sum(acc, axis=0, keepdims=True)
    sq = jnp.sum(acc * acc, axis=0, keepdims=True)
    sum_ref[...] = jnp.broadcast_to(s, sum_ref.shape)
    sumsq_ref[...] = jnp.broadcast_to(sq, sumsq_ref.shape)


def conv_stats_kernel(cols_ref, w_ref, y_ref, psum_ref, psumsq_ref):
    # raw conv tile: single big-K bf16 matmul with f32 accumulation + BN
    # partial sums.  Output stored bf16 (stats come from the f32 accumulator).
    acc = jnp.dot(cols_ref[...], w_ref[...], preferred_element_type=jnp.float32)
    y_ref[...] = acc.astype(y_ref.dtype)
    _col_stats(acc, psum_ref, psumsq_ref)


def conv2_sc_stats_kernel(cols_ref, w_ref, xsc_ref, ws_ref,
                          y_ref, ysc_ref, psum_ref, psumsq_ref,
                          pssum_ref, pssumsq_ref):
    # conv2 (3x3) and the 1x1 projection shortcut fused in one M-tile pass.
    acc = jnp.dot(cols_ref[...], w_ref[...], preferred_element_type=jnp.float32)
    y_ref[...] = acc.astype(y_ref.dtype)
    _col_stats(acc, psum_ref, psumsq_ref)
    acc_s = jnp.dot(xsc_ref[...], ws_ref[...], preferred_element_type=jnp.float32)
    ysc_ref[...] = acc_s.astype(ysc_ref.dtype)
    _col_stats(acc_s, pssum_ref, pssumsq_ref)


def bn_add_bn_relu_kernel(y_ref, ysc_ref, scale_ref, bias_ref,
                          scale_s_ref, bias_s_ref, o_ref):
    # out = relu(bn2(conv2) + bn_s(conv1x1_s))   (projection shortcut)
    main = y_ref[...].astype(jnp.float32) * scale_ref[...] + bias_ref[...]
    sc = ysc_ref[...].astype(jnp.float32) * scale_s_ref[...] + bias_s_ref[...]
    o_ref[...] = jnp.maximum(main + sc, 0.0).astype(o_ref.dtype)


def bn_add_relu_kernel(y_ref, xsc_ref, scale_ref, bias_ref, o_ref):
    # out = relu(bn2(conv2) + x)                 (identity shortcut)
    main = y_ref[...].astype(jnp.float32) * scale_ref[...] + bias_ref[...]
    o_ref[...] = jnp.maximum(main + xsc_ref[...].astype(jnp.float32),
                             0.0).astype(o_ref.dtype)


# ---------------------------------------------------------------------------
# pallas_call wrappers (1-D grid over M; weights / scale / bias stay resident)
# ---------------------------------------------------------------------------
def _conv_stats(cols, w, tm, vmem_limit):
    m_p, k_p = cols.shape
    cout_p = w.shape[1]
    gm = m_p // tm
    stat = jax.ShapeDtypeStruct((gm * 8, cout_p), jnp.float32)
    stat_spec = pl.BlockSpec((8, cout_p), lambda i: (i, 0))
    return pl.pallas_call(
        conv_stats_kernel,
        grid=(gm,),
        in_specs=[pl.BlockSpec((tm, k_p), lambda i: (i, 0)),
                  _const_spec((k_p, cout_p))],
        out_specs=(pl.BlockSpec((tm, cout_p), lambda i: (i, 0)),
                   stat_spec, stat_spec),
        out_shape=(jax.ShapeDtypeStruct((m_p, cout_p), jnp.bfloat16),
                   stat, stat),
        compiler_params=_cparams(vmem_limit),
    )(cols, w)


def _conv2_sc_stats(cols, w, xsc, ws, tm, vmem_limit):
    m_p, k_p = cols.shape
    ks_p = xsc.shape[1]
    cout_p = w.shape[1]
    gm = m_p // tm
    stat = jax.ShapeDtypeStruct((gm * 8, cout_p), jnp.float32)
    stat_spec = pl.BlockSpec((8, cout_p), lambda i: (i, 0))
    tile_out = pl.BlockSpec((tm, cout_p), lambda i: (i, 0))
    return pl.pallas_call(
        conv2_sc_stats_kernel,
        grid=(gm,),
        in_specs=[pl.BlockSpec((tm, k_p), lambda i: (i, 0)),
                  _const_spec((k_p, cout_p)),
                  pl.BlockSpec((tm, ks_p), lambda i: (i, 0)),
                  _const_spec((ks_p, cout_p))],
        out_specs=(tile_out, tile_out,
                   stat_spec, stat_spec, stat_spec, stat_spec),
        out_shape=(jax.ShapeDtypeStruct((m_p, cout_p), jnp.bfloat16),
                   jax.ShapeDtypeStruct((m_p, cout_p), jnp.bfloat16),
                   stat, stat, stat, stat),
        compiler_params=_cparams(vmem_limit),
    )(cols, w, xsc, ws)


def _bn_add_bn_relu(y, ysc, scale, bias, scale_s, bias_s, tm, vmem_limit):
    m_p, cout_p = y.shape
    gm = m_p // tm
    tile = pl.BlockSpec((tm, cout_p), lambda i: (i, 0))
    vec = pl.BlockSpec((1, cout_p), lambda i: (0, 0))
    return pl.pallas_call(
        bn_add_bn_relu_kernel,
        grid=(gm,),
        in_specs=[tile, tile, vec, vec, vec, vec],
        out_specs=tile,
        out_shape=jax.ShapeDtypeStruct((m_p, cout_p), jnp.bfloat16),
        compiler_params=_cparams(vmem_limit),
    )(y, ysc, scale, bias, scale_s, bias_s)


def _bn_add_relu(y, xsc, scale, bias, tm, vmem_limit):
    m_p, cout_p = y.shape
    gm = m_p // tm
    tile = pl.BlockSpec((tm, cout_p), lambda i: (i, 0))
    vec = pl.BlockSpec((1, cout_p), lambda i: (0, 0))
    return pl.pallas_call(
        bn_add_relu_kernel,
        grid=(gm,),
        in_specs=[tile, tile, vec, vec],
        out_specs=tile,
        out_shape=jax.ShapeDtypeStruct((m_p, cout_p), jnp.bfloat16),
        compiler_params=_cparams(vmem_limit),
    )(y, xsc, scale, bias)


# ---------------------------------------------------------------------------
# Wrapper glue (layout conversion, im2col, padding, BN scale/bias fold)
# ---------------------------------------------------------------------------
def _pad2(a, rows, cols):
    return jnp.pad(a, ((0, rows - a.shape[0]), (0, cols - a.shape[1])))


def _im2col(x_nhwc, stride):
    """3x3 / pad-1 im2col: (N*Ho*Wo, 9*C), columns ordered (dy, dx, c)."""
    n, h, w, c = x_nhwc.shape
    ho = (h - 1) // stride + 1
    wo = (w - 1) // stride + 1
    xp = jnp.pad(x_nhwc, ((0, 0), (1, 1), (1, 1), (0, 0)))
    cols = []
    for dy in range(3):
        for dx in range(3):
            tap = xp[:, dy:dy + (ho - 1) * stride + 1:stride,
                     dx:dx + (wo - 1) * stride + 1:stride, :]
            cols.append(tap.reshape(n * ho * wo, c))
    return jnp.concatenate(cols, axis=1), (n, ho, wo)


def _w_to_mat(w):
    """(Cout, Cin, 3, 3) -> (9*Cin, Cout), rows ordered (dy, dx, cin)."""
    cout, cin = w.shape[0], w.shape[1]
    return jnp.transpose(w, (2, 3, 1, 0)).reshape(9 * cin, cout)


def _bn_scale_bias(psum, psumsq, m, gamma, beta, cout_p):
    """Fold per-tile column sums into training-mode BN scale/bias (padded).
    Note: var = E[x^2] - mean^2 in f32 can cancel for |mean| >> std; fine for
    conv activations here, see TODO at top for a Welford-style alternative."""
    total = psum.reshape(-1, 8, cout_p)[:, 0, :].sum(axis=0)
    total_sq = psumsq.reshape(-1, 8, cout_p)[:, 0, :].sum(axis=0)
    mean = total / m
    var = jnp.maximum(total_sq / m - mean * mean, 0.0)
    g = jnp.pad(gamma.astype(jnp.float32), (0, cout_p - gamma.shape[0]))
    b = jnp.pad(beta.astype(jnp.float32), (0, cout_p - beta.shape[0]))
    scale = g * jax.lax.rsqrt(var + EPS)
    bias = b - mean * scale
    return scale.reshape(1, cout_p), bias.reshape(1, cout_p)


def basic_block_forward(x_nchw, params, stride, tm_max=TM_MAX):
    in_planes = x_nchw.shape[1]
    planes = params["w1"].shape[0]
    has_proj = (stride != 1) or (in_planes != planes)

    x = jnp.transpose(x_nchw, (0, 2, 3, 1)).astype(jnp.float32)  # NHWC
    n = x.shape[0]

    # ---- im2col for conv1 + problem sizing ---------------------------------
    cols1, (_, ho, wo) = _im2col(x, stride)
    m = n * ho * wo
    cout_p = _round_up(planes, 128)
    k1_p = _round_up(9 * in_planes, 128)
    k2_p = _round_up(9 * planes, 128)
    ks_p = _round_up(in_planes, 128) if has_proj else cout_p

    vmem_limit = _vmem_budget()
    wbuf = 1 if _single_buffer_ok() else 2
    streamed = max(
        (k1_p + cout_p) * 2,                                        # conv1 call
        (k2_p + (ks_p if has_proj else 0)
         + cout_p * (2 if has_proj else 1)) * 2)                    # conv2 call
    resident = max(
        wbuf * k1_p * cout_p * 2,
        wbuf * (k2_p + (ks_p if has_proj else 0)) * cout_p * 2)
    tm = _pick_tm(m, streamed, resident, vmem_limit, tm_max)
    m_p = _round_up(m, tm)

    # ---- conv1 (3x3, stride, pad 1) -> raw bf16 output + BN stats ----------
    cols1_p = _pad2(cols1, m_p, k1_p).astype(jnp.bfloat16)
    w1_p = _pad2(_w_to_mat(params["w1"]), k1_p, cout_p).astype(jnp.bfloat16)
    y1, s1, q1 = _conv_stats(cols1_p, w1_p, tm, vmem_limit)          # bf16
    scale1, bias1 = _bn_scale_bias(s1, q1, m, params["g1"], params["b1"], cout_p)

    # ---- bn1 + relu, fused by XLA into the conv2 im2col (no extra pass) ----
    # Applied on the image BEFORE conv2's zero padding so pad pixels stay 0.
    y1_img = y1[:m, :planes].reshape(n, ho, wo, planes).astype(jnp.float32)
    out1_img = jnp.maximum(y1_img * scale1[0, :planes] + bias1[0, :planes], 0.0)

    # ---- conv2 (3x3, stride 1, pad 1) + bn2 + shortcut + relu --------------
    cols2, _ = _im2col(out1_img, 1)
    cols2_p = _pad2(cols2, m_p, k2_p).astype(jnp.bfloat16)
    w2_p = _pad2(_w_to_mat(params["w2"]), k2_p, cout_p).astype(jnp.bfloat16)

    if has_proj:
        x_sc = x[:, ::stride, ::stride, :].reshape(m, in_planes)
        xsc_p = _pad2(x_sc, m_p, ks_p).astype(jnp.bfloat16)
        ws_mat = jnp.transpose(params["ws"].reshape(planes, in_planes), (1, 0))
        ws_p = _pad2(ws_mat, ks_p, cout_p).astype(jnp.bfloat16)

        y2, ysc, s2, q2, ss, qs = _conv2_sc_stats(
            cols2_p, w2_p, xsc_p, ws_p, tm, vmem_limit)
        scale2, bias2 = _bn_scale_bias(s2, q2, m, params["g2"], params["b2"], cout_p)
        scale_s, bias_s = _bn_scale_bias(ss, qs, m, params["gs"], params["bs"], cout_p)
        out = _bn_add_bn_relu(y2, ysc, scale2, bias2, scale_s, bias_s,
                              tm, vmem_limit)
    else:
        y2, s2, q2 = _conv_stats(cols2_p, w2_p, tm, vmem_limit)
        scale2, bias2 = _bn_scale_bias(s2, q2, m, params["g2"], params["b2"], cout_p)
        x_sc = _pad2(x.reshape(m, in_planes), m_p, cout_p).astype(jnp.bfloat16)
        out = _bn_add_relu(y2, x_sc, scale2, bias2, tm, vmem_limit)

    out_nhwc = out[:m, :planes].astype(jnp.float32).reshape(n, ho, wo, planes)
    return jnp.transpose(out_nhwc, (0, 3, 1, 2))  # back to NCHW


# ---------------------------------------------------------------------------
# Pure-JAX reference (for correctness check only)
# ---------------------------------------------------------------------------
def ref_forward(x, params, stride):
    def conv(x, w, s, pad):
        return jax.lax.conv_general_dilated(
            x, w, (s, s), ((pad, pad), (pad, pad)),
            dimension_numbers=("NCHW", "OIHW", "NCHW"))

    def bn(y, g, b):
        mean = jnp.mean(y, axis=(0, 2, 3), keepdims=True)
        var = jnp.mean((y - mean) ** 2, axis=(0, 2, 3), keepdims=True)
        yn = (y - mean) * jax.lax.rsqrt(var + EPS)
        return yn * g.reshape(1, -1, 1, 1) + b.reshape(1, -1, 1, 1)

    in_planes, planes = x.shape[1], params["w1"].shape[0]
    out = jax.nn.relu(bn(conv(x, params["w1"], stride, 1),
                         params["g1"], params["b1"]))
    out = bn(conv(out, params["w2"], 1, 1), params["g2"], params["b2"])
    if stride != 1 or in_planes != planes:
        sc = bn(conv(x, params["ws"], stride, 0), params["gs"], params["bs"])
    else:
        sc = x
    return jax.nn.relu(out + sc)


def make_params(key, in_planes, planes, has_proj):
    ks = jax.random.split(key, 8)
    p = {
        "w1": 0.1 * jax.random.normal(ks[0], (planes, in_planes, 3, 3), jnp.float32),
        "g1": 1.0 + 0.1 * jax.random.normal(ks[1], (planes,), jnp.float32),
        "b1": 0.1 * jax.random.normal(ks[2], (planes,), jnp.float32),
        "w2": 0.1 * jax.random.normal(ks[3], (planes, planes, 3, 3), jnp.float32),
        "g2": 1.0 + 0.1 * jax.random.normal(ks[4], (planes,), jnp.float32),
        "b2": 0.1 * jax.random.normal(ks[5], (planes,), jnp.float32),
    }
    if has_proj:
        p["ws"] = 0.1 * jax.random.normal(ks[6], (planes, in_planes, 1, 1), jnp.float32)
        p["gs"] = 1.0 + 0.1 * jax.random.normal(ks[7], (planes,), jnp.float32)
        p["bs"] = jnp.zeros((planes,), jnp.float32)
    return p


if __name__ == "__main__":
    key = jax.random.PRNGKey(0)
    kx, kp1, kp2 = jax.random.split(key, 3)

    N, in_planes, H, W = 2, 4, 16, 16
    x = jax.random.normal(kx, (N, in_planes, H, W), jnp.float32)

    # bf16 MXU inputs + bf16 intermediates with f32 accumulation/statistics
    # -> slightly looser tolerance than a pure-f32 pipeline.
    TOL = dict(atol=3e-2, rtol=3e-2)

    # Case 1: downsampling block (stride=2, 4 -> 8 channels): projection shortcut.
    planes, stride = 8, 2
    params = make_params(kp1, in_planes, planes, has_proj=True)
    out = jax.block_until_ready(basic_block_forward(x, params, stride))
    ref = jax.block_until_ready(ref_forward(x, params, stride))
    assert out.shape == (N, planes, H // stride, W // stride)
    np.testing.assert_allclose(np.asarray(out), np.asarray(ref), **TOL)

    # Case 2: identity-shortcut block (stride=1, in_planes == planes).
    params_id = make_params(kp2, in_planes, in_planes, has_proj=False)
    out_id = jax.block_until_ready(basic_block_forward(x, params_id, 1))
    ref_id = jax.block_until_ready(ref_forward(x, params_id, 1))
    assert out_id.shape == (N, in_planes, H, W)
    np.testing.assert_allclose(np.asarray(out_id), np.asarray(ref_id), **TOL)

    print("KERNEL_OK")
</pallas_src>

<mosaic_0001>
module attributes {stable_mosaic.version = 11 : i64} {
  func.func @k(%arg0: i32, %arg1: memref<8x128xf32, #tpu.memory_space<vmem>>, %arg2: memref<8x128xf32, #tpu.memory_space<vmem>>, %arg3: memref<8x128xf32, #tpu.memory_space<vmem>>) attributes {dimension_semantics = [#tpu.dimension_semantics<arbitrary>], iteration_bounds = array<i64: 2>, scalar_prefetch = 0 : i64, scratch_operands = 0 : i64, tpu.core_type = #tpu.core_type<tc>, window_params = [{pipeline_mode = #tpu.pipeline_mode<synchronous>, transform_indices = @transform_0, window_bounds = array<i64: 8, 128>}, {transform_indices = @transform_1, window_bounds = array<i64: 8, 128>}, {transform_indices = @transform_2, window_bounds = array<i64: 8, 128>}]} {
    %c0 = arith.constant 0 : index
    %c0_0 = arith.constant 0 : index
    %0 = vector.load %arg2[%c0, %c0_0] : memref<8x128xf32, #tpu.memory_space<vmem>>, vector<8x128xf32>
    %c0_1 = arith.constant 0 : index
    %c0_2 = arith.constant 0 : index
    %1 = vector.load %arg1[%c0_1, %c0_2] : memref<8x128xf32, #tpu.memory_space<vmem>>, vector<8x128xf32>
    %2 = arith.addf %0, %1 : vector<8x128xf32>
    %c0_3 = arith.constant 0 : index
    %c0_4 = arith.constant 0 : index
    %3 = vector.load %arg3[%c0_3, %c0_4] : memref<8x128xf32, #tpu.memory_space<vmem>>, vector<8x128xf32>
    tpu.vector_store %arg3[%c0_3, %c0_4], %2 {strides = array<i32>} : memref<8x128xf32, #tpu.memory_space<vmem>>, vector<8x128xf32>,
    return
  }
  func.func @transform_0(%arg0: i32) -> (i32, i32) {
    %c0_i32 = arith.constant 0 : i32
    %c0_i32_0 = arith.constant 0 : i32
    %c0_i32_1 = arith.constant 0 : i32
    return %c0_i32, %c0_i32_0 : i32, i32
  }
  func.func @transform_1(%arg0: i32) -> (i32, i32) {
    %c0_i32 = arith.constant 0 : i32
    %c0_i32_0 = arith.constant 0 : i32
    return %arg0, %c0_i32 : i32, i32
  }
  func.func @transform_2(%arg0: i32) -> (i32, i32) {
    %c0_i32 = arith.constant 0 : i32
    %c0_i32_0 = arith.constant 0 : i32
    return %arg0, %c0_i32 : i32, i32
  }
}

module attributes {stable_mosaic.version = 11 : i64} {
  func.func @conv_stats_kernel(%arg0: i32, %arg1: memref<128x128xbf16, #tpu.memory_space<vmem>>, %arg2: memref<128x128xbf16, #tpu.memory_space<vmem>>, %arg3: memref<128x128xbf16, #tpu.memory_space<vmem>>, %arg4: memref<8x128xf32, #tpu.memory_space<vmem>>, %arg5: memref<8x128xf32, #tpu.memory_space<vmem>>) attributes {dimension_semantics = [#tpu.dimension_semantics<parallel>], iteration_bounds = array<i64: 1>, scalar_prefetch = 0 : i64, scratch_operands = 0 : i64, tpu.core_type = #tpu.core_type<tc>, window_params = [{transform_indices = @transform_0, window_bounds = array<i64: 128, 128>}, {pipeline_mode = #tpu.pipeline_mode<synchronous>, transform_indices = @transform_1, window_bounds = array<i64: 128, 128>}, {transform_indices = @transform_2, window_bounds = array<i64: 128, 128>}, {transform_indices = @transform_3, window_bounds = array<i64: 8, 128>}, {transform_indices = @transform_4, window_bounds = array<i64: 8, 128>}]} {
    %c0 = arith.constant 0 : index
    %c0_0 = arith.constant 0 : index
    %0 = vector.load %arg1[%c0, %c0_0] : memref<128x128xbf16, #tpu.memory_space<vmem>>, vector<128x128xbf16>
    %c0_1 = arith.constant 0 : index
    %c0_2 = arith.constant 0 : index
    %1 = vector.load %arg2[%c0_1, %c0_2] : memref<128x128xbf16, #tpu.memory_space<vmem>>, vector<128x128xbf16>
    %cst = arith.constant dense<0.000000e+00> : vector<128x128xf32>
    %2 = tpu.matmul %0, %1, %cst {dimension_numbers = #tpu.dot_dimension_numbers<[1], [0], [0], [1], [0, 0, 1, 1], [], []>} : vector<128x128xbf16>, vector<128x128xbf16>, vector<128x128xf32> -> vector<128x128xf32>
    %3 = arith.truncf %2 : vector<128x128xf32> to vector<128x128xbf16>
    %c0_3 = arith.constant 0 : index
    %c0_4 = arith.constant 0 : index
    %4 = vector.load %arg3[%c0_3, %c0_4] : memref<128x128xbf16, #tpu.memory_space<vmem>>, vector<128x128xbf16>
    tpu.vector_store %arg3[%c0_3, %c0_4], %3 {strides = array<i32>} : memref<128x128xbf16, #tpu.memory_space<vmem>>, vector<128x128xbf16>,
    %cst_5 = arith.constant dense<0.000000e+00> : vector<128xf32>
    %5 = vector.multi_reduction <add>, %2, %cst_5 [0] : vector<128x128xf32> to vector<128xf32>
    %6 = vector.shape_cast %5 : vector<128xf32> to vector<1x128xf32>
    %7 = arith.mulf %2, %2 : vector<128x128xf32>
    %cst_6 = arith.constant dense<0.000000e+00> : vector<128xf32>
    %8 = vector.multi_reduction <add>, %7, %cst_6 [0] : vector<128x128xf32> to vector<128xf32>
    %9 = vector.shape_cast %8 : vector<128xf32> to vector<1x128xf32>
    %10 = vector.shape_cast %6 : vector<1x128xf32> to vector<1x128xf32>
    %11 = vector.broadcast %10 : vector<1x128xf32> to vector<8x128xf32>
    %c0_7 = arith.constant 0 : index
    %c0_8 = arith.constant 0 : index
    %12 = vector.load %arg4[%c0_7, %c0_8] : memref<8x128xf32, #tpu.memory_space<vmem>>, vector<8x128xf32>
    tpu.vector_store %arg4[%c0_7, %c0_8], %11 {strides = array<i32>} : memref<8x128xf32, #tpu.memory_space<vmem>>, vector<8x128xf32>,
    %13 = vector.shape_cast %9 : vector<1x128xf32> to vector<1x128xf32>
    %14 = vector.broadcast %13 : vector<1x128xf32> to vector<8x128xf32>
    %c0_9 = arith.constant 0 : index
    %c0_10 = arith.constant 0 : index
    %15 = vector.load %arg5[%c0_9, %c0_10] : memref<8x128xf32, #tpu.memory_space<vmem>>, vector<8x128xf32>
    tpu.vector_store %arg5[%c0_9, %c0_10], %14 {strides = array<i32>} : memref<8x128xf32, #tpu.memory_space<vmem>>, vector<8x128xf32>,
    return
  }
  func.func @transform_0(%arg0: i32) -> (i32, i32) {
    %c0_i32 = arith.constant 0 : i32
    %c0_i32_0 = arith.constant 0 : i32
    return %arg0, %c0_i32 : i32, i32
  }
  func.func @transform_1(%arg0: i32) -> (i32, i32) {
    %c0_i32 = arith.constant 0 : i32
    %c0_i32_0 = arith.constant 0 : i32
    %c0_i32_1 = arith.constant 0 : i32
    return %c0_i32, %c0_i32_0 : i32, i32
  }
  func.func @transform_2(%arg0: i32) -> (i32, i32) {
    %c0_i32 = arith.constant 0 : i32
    %c0_i32_0 = arith.constant 0 : i32
    return %arg0, %c0_i32 : i32, i32
  }
  func.func @transform_3(%arg0: i32) -> (i32, i32) {
    %c0_i32 = arith.constant 0 : i32
    %c0_i32_0 = arith.constant 0 : i32
    return %arg0, %c0_i32 : i32, i32
  }
  func.func @transform_4(%arg0: i32) -> (i32, i32) {
    %c0_i32 = arith.constant 0 : i32
    %c0_i32_0 = arith.constant 0 : i32
    return %arg0, %c0_i32 : i32, i32
  }
}

</mosaic_0001>

<bundles_post_ra>
// kernel: tpu_custom_call.1
= control target key start
LH: loop header
LB: loop body
LE: loop exit
PB: predicated region body
PF: predicated region fallthrough
CT: control target
= control target key end

     0   :  { %7 = vsyncpa [#allocation3], 0  ;;  %s651_s0 = inlined_call_operand.hbm [shape: f32[8,128], index: 0, kind: input, shape index: {}]   ;;  %s652_s1 = inlined_call_operand.hbm [shape: f32[16,128], index: 1, kind: input, shape index: {}]   ;;  %s653_s2 = inlined_call_operand.hbm [shape: f32[16,128], index: 2, kind: output, shape index: {}]  }
   0x1   :  { %8 = vsyncpa [#allocation6], 0 }
   0x2   :  { %10 = vsyncpa [#allocation6 + $0x1], 0 }
   0x3   :  { %11 = vsyncpa [#allocation4], 0 }
   0x4   :  { %13 = vsyncpa [#allocation4 + $0x1], 0  ;;  %s485_s9 = smov 0   ;;  %s487_s10 = smov 0  }
   0x5   :  { %s489_s11 = smov 0   ;;  %s491_s12 = smov 0  }
   0x6 LB: > { %s506_s13 = sadd.s32 4294967295, %s465_s12   ;;  %s272_s14 = sadd.s32 4294967294, %s465_s12   ;;  %s465_s12 = sphi %s491_s12, %s676_s12   ;;  %s461_s11 = sphi %s489_s11, %s675_s11   ;;  %s457_s10 = sphi %s487_s10, %s674_s10   ;;  %s453_s9 = sphi %s485_s9, %s673_s9  }
   0x7   : > { %p60_p0 = scmp.ne.s32.totalorder %s457_s10, %s453_s9  ;;  %p654_p1 = scmp.eq.s32.totalorder %s506_s13, 0 }
   0x8   : > { %p90_p3 = scmp.eq.s32.totalorder %s272_s14, 1  ;;  %p273_p5 = scmp.ge.s32.totalorder %s465_s12, 1 }
   0x9   : > { %p515_p4 = por %p654_p1, %p60_p0  ;;  %p97_p7 = scmp.lt.s32.totalorder %s465_s12, 3 }
   0xa   : > { %p520_p6 = por %p90_p3, %p60_p0  ;;  %s467_s18 = smov [#allocation2]  }
   0xb   : > { %s658_s15 = scalar_select %p515_p4, 1, 0 }
   0xc   : > { %s659_s16 = scalar_select %p520_p6, 1, 0 }
   0xd   : > { %p525_p8 = pnand %p273_p5, %p97_p7  ;;  %s110_s19 = sshll.u32 %s467_s18, 4  ;;  %s111_s19 = int_to_ptr.vmem [resolvable:$true] %s110_s19 }
   0xe   : > { %s533_s20 = sadd.s32 1, %s465_s12   ;;  %s47_s24 = sadd.s32 1, %s461_s11 }
   0xf   : > { %s660_s17 = scalar_select %p525_p8, 1, 0 }
  0x10   : > { %p294_p10 = pneg %p525_p8  ;;  %s44_s22 = ssub.s32 %s465_s12, %s533_s20 }
  0x11   : > { %p543_p12 = scmp.eq.s32.totalorder %s44_s22, 0  ;;  %p54_p13 = scmp.ne.s32.totalorder %s461_s11, %s457_s10 }
  0x12   : > { %p537_p11 = pnand %p294_p10, %p654_p1  ;;  %s354_s25 = scalar_lea.vmem %s111_s19, 128 }
  0x13   : > { %p355_p3 = scmp.ne.s32.totalorder %s111_s19, %s354_s25  ;;  %p362_p9 = scmp.lt.s32.totalorder %s111_s19, %s111_s19 }
  0x14   : > { %p345_p0 = pneg %p537_p11  ;;  %p363_p2 = scmp.lt.s32.totalorder %s354_s25, %s354_s25 }
  0x16   : > { %p357_p5 = pnand %p355_p3, %p345_p0  ;;  %p364_p10 = por %p363_p2, %p362_p9 }
  0x18   : > { %p358_p7 = pneg %p357_p5 }
  0x1a   : > { %p365_p1 = pnand %p364_p10, %p358_p7 }
  0x1c   : > { %368 = shalt.err (!%p365_p1)
}
  0x1d   : > { %297 = dma.hbm_to_vmem [thread:$0]  (!%p537_p11), %s651_s0, 128, %s111_s19, [#allocation3]  }
  0x1e   : > { %s560_s28 = scalar_select %p543_p12, %s461_s11, %s47_s24  }
  0x1f   : > { %p55_p1 = scmp.eq.s32.totalorder %s465_s12, 0  ;;  %p663_p2 = scmp.eq.s32.totalorder %s506_s13, 1 }
  0x20   : > { %p307_p0 = scmp.lt.s32.totalorder %s465_s12, 2  ;;  %s121_s30 = sand.u32 1, %s461_s11  }
  0x21   : > { %p568_p9 = por %p663_p2, %p54_p13  ;;  %p56_p3 = por %p55_p1, %p54_p13 }
  0x22   : > { %s276_s3 = sshll.u32 %s121_s30, 3  ;;  %s277_s4 = sshll.u32 %s465_s12, 7 }
  0x23   : > { %s664_s29 = scalar_select %p568_p9, 1, 0 }
  0x24   : > { %s581_s7 = scalar_lea.hbm %s652_s1, %s277_s4  ;;  %s125_s8 = scalar_lea.vmem [#allocation5], %s276_s3 }
  0x25   : > { %s132_s14 = sshll.u32 %s125_s8, 4  ;;  %p583_p11 = pnand %p307_p0, %p56_p3  ;;  %s133_s14 = int_to_ptr.vmem [resolvable:$true] %s132_s14 }
  0x26   : > { %s122_s19 = scalar_lea.sflag [#allocation6], %s121_s30  ;;  %s369_s21 = scalar_lea.hbm %s581_s7, 128 }
  0x27   : > { %p370_p12 = scmp.ne.s32.totalorder %s581_s7, %s369_s21  ;;  %p371_p13 = pneg %p583_p11 }
  0x28   : > { %s374_s24 = scalar_lea.hbm %s652_s1, 256  ;;  %p375_p10 = scmp.lt.s32.totalorder %s581_s7, %s652_s1 }
  0x29   : > { %p372_p5 = pnand %p371_p13, %p370_p12  ;;  %p376_p1 = scmp.lt.s32.totalorder %s374_s24, %s369_s21 }
  0x2b   : > { %p373_p7 = pneg %p372_p5  ;;  %p377_p2 = por %p376_p1, %p375_p10 }
  0x2d   : > { %p378_p0 = pnand %p377_p2, %p373_p7 }
  0x2f   : > { %381 = shalt.err (!%p378_p0)
}
  0x30   : > { %s382_s27 = scalar_lea.vmem %s133_s14, 128  ;;  %s468_s30 = smov [#allocation5]  }
  0x31   : > { %p383_p3 = scmp.ne.s32.totalorder %s133_s14, %s382_s27  ;;  %s387_s3 = sshll.u32 %s468_s30, 4  ;;  %s388_s3 = int_to_ptr.vmem [resolvable:$false] %s387_s3 }
  0x32   : > { %s389_s4 = scalar_lea.vmem %s388_s3, 256  ;;  %p390_p12 = scmp.lt.s32.totalorder %s133_s14, %s388_s3 }
  0x33   : > { %p385_p6 = pnand %p383_p3, %p371_p13  ;;  %p391_p5 = scmp.lt.s32.totalorder %s389_s4, %s382_s27 }
  0x35   : > { %p386_p9 = pneg %p385_p6  ;;  %p392_p4 = por %p391_p5, %p390_p12 }
  0x37   : > { %p393_p8 = pnand %p392_p4, %p386_p9 }
  0x39   : > { %396 = shalt.err (!%p393_p8)
}
  0x3a   : > { %301 = dma.hbm_to_vmem [thread:$0]  (!%p583_p11), %s581_s7, 128, %s133_s14, %s122_s19  }
  0x3b   : > { %p666_p7 = scmp.ne.s32.totalorder %s660_s17, 0 }
  0x3c   : > { %p667_p10 = scmp.eq.s32.totalorder (!%p666_p7), %s506_s13, 0 }
  0x3d   : > { %141 = sbr.rel (%p666_p7) target bundleno = 96 (0x60), region = 28 }
  0x42   : > { %440 = dma.done.wait (%p667_p10), [#allocation3], 128   ;;  %p668_p6 = pmov %p667_p10 }
  0x43   : > { %s608_s5 = sand.u32 1, %s457_s10   ;;  %p669_p4 = scmp.ne.s32.totalorder %s658_s15, 0 }
  0x44   : > { %442 = vsyncadd (%p668_p6), [#allocation3], 4294967168  ;;  %s280_s6 = sshll.u32 %s608_s5, 3  ;;  %s148_s8 = scalar_lea.sflag [#allocation6], %s608_s5 }
  0x45   : > { %s151_s18 = scalar_lea.vmem [#allocation5], %s280_s6 }
  0x46   : > { %444 = dma.done.wait (%p669_p4), %s148_s8, 128  }
  0x47   : > { %446 = vsyncadd (%p669_p4), %s148_s8, 4294967168  ;;  %s171_s17 = scalar_lea.vmem [#allocation7], %s280_s6  ;;  %s283_s14 = sshll.u32 %s506_s13, 7  ;;  %v172_v0 = vld [vmem:[%s151_s18] sm:$0xff]  ;;  %v173_v1 = vld [vmem:[#allocation2] sm:$0xff] }
  0x48   : > { %s190_s7 = sshll.u32 %s171_s17, 4  ;;  %v174_v2 = vadd.f32 %v173_v1, %v172_v0  ;;  %s188_s22 = scalar_lea.hbm %s653_s2, %s283_s14  ;;  %s191_s7 = int_to_ptr.vmem [resolvable:$true] %s190_s7 }
  0x49   : > { %s177_s23 = scalar_lea.sflag [#allocation4], %s608_s5  ;;  %s397_s24 = scalar_lea.vmem %s191_s7, 128 }
  0x4a   : > { %175 = vst [vmem:[%s171_s17] sm:$0xff] %v174_v2  ;;  %p398_p8 = scmp.ne.s32.totalorder %s191_s7, %s397_s24  ;;  %p670_p9 = scmp.ne.s32.totalorder %s664_s29, 0 }
  0x4b   : > { %s469_s15 = smov [#allocation7]  }
  0x4c   : > { %p399_p11 = pnand %p398_p8, %p670_p9  ;;  %s401_s25 = sshll.u32 %s469_s15, 4  ;;  %s402_s25 = int_to_ptr.vmem [resolvable:$false] %s401_s25 }
  0x4d   : > { %s403_s26 = scalar_lea.vmem %s402_s25, 256  ;;  %p404_p1 = scmp.lt.s32.totalorder %s191_s7, %s402_s25 }
  0x4e   : > { %p400_p13 = pneg %p399_p11  ;;  %p405_p2 = scmp.lt.s32.totalorder %s403_s26, %s397_s24 }
  0x50   : > { %p406_p0 = por %p405_p2, %p404_p1 }
  0x52   : > { %p407_p3 = pnand %p406_p0, %p400_p13 }
  0x54   : > { %410 = shalt.err (!%p407_p3)
}
  0x55   : > { %s411_s13 = scalar_lea.hbm %s188_s22, 128  ;;  %s415_s3 = scalar_lea.hbm %s653_s2, 256 }
  0x56   : > { %p412_p12 = scmp.ne.s32.totalorder %s188_s22, %s411_s13  ;;  %p416_p10 = scmp.lt.s32.totalorder %s188_s22, %s653_s2 }
  0x57   : > { %p417_p6 = scmp.lt.s32.totalorder %s415_s3, %s411_s13 }
  0x58   : > { %p413_p5 = pnand %p412_p12, %p670_p9 }
  0x59   : > { %p418_p4 = por %p417_p6, %p416_p10 }
  0x5a   : > { %p414_p7 = pneg %p413_p5 }
  0x5c   : > { %p419_p8 = pnand %p418_p4, %p414_p7 }
  0x5e   : > { %422 = shalt.err (!%p419_p8)
}
  0x5f   : > { %292 = dma.vmem_to_hbm [thread:$0]  (%p670_p9), %s191_s7, 128, %s188_s22, %s177_s23  }
  0x60 PF: > { %s202_s6 = sand.u32 1, %s453_s9   ;;  %p671_p11 = scmp.ne.s32.totalorder %s659_s16, 0 }
  0x61   : > { %p672_p13 = scmp.ge.s32.totalorder %s465_s12, 2  ;;  %s203_s8 = scalar_lea.sflag [#allocation4], %s202_s6 }
  0x63   : > { %p303_p1 = pnand %p672_p13, %p671_p11 }
  0x65   : > { %p304_p2 = pneg %p303_p1 }
  0x67   : > { %448 = dma.done.wait (%p304_p2), %s203_s8, 128  }
  0x68   : > { %450 = vsyncadd (%p304_p2), %s203_s8, 4294967168  ;;  %p16_p0 = scmp.ge.s32.totalorder %s533_s20, 4   ;;  %s673_s9 = smov %s457_s10 }
  0x69   : > { %s674_s10 = smov %s461_s11  ;;  %s675_s11 = smov %s560_s28 }
  0x6a   : > { %s676_s12 = smov %s533_s20  ;;  %18 = sbr.rel (!%p16_p0) target bundleno = 6 (0x6), region = 78 }
  0x6f   :  { %208 = vsyncpa [#allocation3], 1 }
  0x70   :  { %210 = vsyncpa [#allocation3 + $0x1], 1 }
  0x71   :  { %211 = vsyncpa [#allocation6], 1 }
  0x72   :  { %213 = vsyncpa [#allocation6 + $0x1], 1 }
  0x73   :  { %214 = vsyncpa [#allocation4], 1 }
  0x74   :  { %216 = vsyncpa [#allocation4 + $0x1], 1 }

// kernel: tpu_custom_call.1
= control target key start
LH: loop header
LB: loop body
LE: loop exit
PB: predicated region body
PF: predicated region fallthrough
CT: control target
= control target key end

     0   :  { %10 = vsyncpa [#allocation3], 0  ;;  %s825_s0 = inlined_call_operand.hbm [shape: bf16[128,128], index: 0, kind: input, shape index: {}]   ;;  %s826_s1 = inlined_call_operand.hbm [shape: bf16[128,128], index: 1, kind: input, shape index: {}]   ;;  %s827_s2 = inlined_call_operand.hbm [shape: bf16[128,128], index: 2, kind: output, shape index: {0}]   ;;  %s828_s3 = inlined_call_operand.hbm [shape: f32[8,128], index: 3, kind: output, shape index: {1}]   ;;  %s829_s4 = inlined_call_operand.hbm [shape: f32[8,128], index: 4, kind: output, shape index: {2}]  }
   0x1   :  { %11 = vsyncpa [#allocation6], 0 }
   0x2   :  { %12 = vsyncpa [#allocation4], 0 }
   0x3   :  { %13 = vsyncpa [#allocation9], 0  ;;  %s745_s15 = smov [#allocation2]  }
   0x4   :  { %s19_s16 = sshll.u32 %s745_s15, 4  ;;  %s20_s16 = int_to_ptr.vmem [resolvable:$true] %s19_s16 }
   0x5   :  { %s645_s17 = scalar_lea.vmem %s20_s16, 1024  ;;  %p650_p1 = scmp.lt.s32.totalorder %s20_s16, %s20_s16 }
   0x6   :  { %p646_p0 = scmp.ne.s32.totalorder %s20_s16, %s645_s17  ;;  %p651_p2 = scmp.lt.s32.totalorder %s645_s17, %s645_s17 }
   0x8   :  { %p652_p3 = por %p651_p2, %p650_p1 }
   0xa   :  { %p653_p4 = pnand %p652_p3, %p646_p0 }
   0xc   :  { %656 = shalt.err (!%p653_p4)
}
   0xd   :  { %s746_s18 = smov 64   ;;  %s747_s19 = smov 4  }
   0xe   :  { %25 = dma.hbm_to_vmem [thread:$0]  %s825_s0, 1024, %s20_s16, [#allocation3], %s746_s18, %s746_s18, %s747_s19  }
   0xf   :  { %s748_s22 = smov [#allocation5]  }
  0x10   :  { %s31_s23 = sshll.u32 %s748_s22, 4  ;;  %s32_s23 = int_to_ptr.vmem [resolvable:$true] %s31_s23 }
  0x11   :  { %s665_s24 = scalar_lea.vmem %s32_s23, 1024  ;;  %p670_p6 = scmp.lt.s32.totalorder %s32_s23, %s32_s23 }
  0x12   :  { %p666_p5 = scmp.ne.s32.totalorder %s32_s23, %s665_s24  ;;  %p671_p7 = scmp.lt.s32.totalorder %s665_s24, %s665_s24 }
  0x14   :  { %p672_p8 = por %p671_p7, %p670_p6 }
  0x16   :  { %p673_p9 = pnand %p672_p8, %p666_p5 }
  0x18   :  { %676 = shalt.err (!%p673_p9)
}
  0x19   :  { %37 = dma.hbm_to_vmem [thread:$0]  %s826_s1, 1024, %s32_s23, [#allocation6], %s746_s18, %s746_s18, %s747_s19  }
  0x1a   :  { %737 = dma.done.wait [#allocation3], 1024  }
  0x1b   :  { %738 = vsyncadd [#allocation3], 4294966272 }
  0x1c   :  { %739 = dma.done.wait [#allocation6], 1024  }
  0x1d   :  { %740 = vsyncadd [#allocation6], 4294966272  ;;  %v621_v0 = vld [vmem:[#allocation5 + $0x38] sm:$0xff]   ;;  %v622_v1 = vld [vmem:[#allocation5 + $0x30] sm:$0xff]   ;;  %s749_s0 = smov [#allocation7]  }
  0x1e   :  { %566 = vmatprep.subr.bf16.mxu0 %v621_v0  ;;  %598 = vmatprep.subr.bf16.mxu1 %v621_v0  ;;  %v623_v2 = vld [vmem:[#allocation5 + $0x28] sm:$0xff]   ;;  %v624_v3 = vld [vmem:[#allocation5 + $0x20] sm:$0xff]   ;;  %v625_v5 = vld [vmem:[#allocation5 + $0x18] sm:$0xff]   ;;  %s415_s1 = sshll.u32 %s749_s0, 4  ;;  %s416_s1 = int_to_ptr.vmem [resolvable:$true] %s415_s1 }
  0x1f   :  { %567 = vmatpush3.bf16.msra.mxu0 %v621_v0  ;;  %606 = vmatpush3.bf16.msra.mxu1 %v621_v0  ;;  %v629_v4 = vld [vmem:[#allocation2] sm:$0xff]   ;;  %v626_v7 = vld [vmem:[#allocation5 + $0x10] sm:$0xff]   ;;  %v627_v8 = vld [vmem:[#allocation5 + $0x8] sm:$0xff]   ;;  %s677_s27 = scalar_lea.vmem %s416_s1, 1024  ;;  %p682_p11 = scmp.lt.s32.totalorder %s416_s1, %s416_s1 }
  0x20   :  { %568 = vmatprep.subr.bf16.mxu0 %v622_v1  ;;  %599 = vmatprep.subr.bf16.mxu1 %v622_v1  ;;  %v633_v6 = vld [vmem:[#allocation2 + $0x20] sm:$0xff]   ;;  %v630_v10 = vld [vmem:[#allocation2 + $0x8] sm:$0xff]   ;;  %v631_v12 = vld [vmem:[#allocation2 + $0x10] sm:$0xff]   ;;  %p678_p10 = scmp.ne.s32.totalorder %s416_s1, %s677_s27  ;;  %p683_p12 = scmp.lt.s32.totalorder %s677_s27, %s677_s27 }
  0x21   :  { %582 = vmatprep.mubr.bf16.mxu0 %v629_v4  ;;  %590 = vmatprep.mubr.bf16.mxu1 %v633_v6  ;;  %v628_v9 = vld [vmem:[#allocation5] sm:$0xff]   ;;  %v634_v11 = vld [vmem:[#allocation2 + $0x28] sm:$0xff]   ;;  %v635_v13 = vld [vmem:[#allocation2 + $0x30] sm:$0xff]  }
  0x22   :  { %v632_v14 = vld [vmem:[#allocation2 + $0x18] sm:$0xff]   ;;  %p684_p13 = por %p683_p12, %p682_p11 }
  0x23   :  { %569 = vmatpush3.bf16.msra.mxu0 %v622_v1  ;;  %607 = vmatpush3.bf16.msra.mxu1 %v622_v1  ;;  %v636_v15 = vld [vmem:[#allocation2 + $0x38] sm:$0xff]  }
  0x24   :  { %570 = vmatprep.subr.bf16.mxu0 %v623_v2  ;;  %600 = vmatprep.subr.bf16.mxu1 %v623_v2  ;;  %p685_p0 = pnand %p684_p13, %p678_p10 }
  0x27   :  { %571 = vmatpush3.bf16.msra.mxu0 %v623_v2  ;;  %608 = vmatpush3.bf16.msra.mxu1 %v623_v2 }
  0x28   :  { %572 = vmatprep.subr.bf16.mxu0 %v624_v3  ;;  %601 = vmatprep.subr.bf16.mxu1 %v624_v3 }
  0x2b   :  { %573 = vmatpush3.bf16.msra.mxu0 %v624_v3  ;;  %609 = vmatpush3.bf16.msra.mxu1 %v624_v3 }
  0x2c   :  { %574 = vmatprep.subr.bf16.mxu0 %v625_v5  ;;  %602 = vmatprep.subr.bf16.mxu1 %v625_v5 }
  0x2f   :  { %575 = vmatpush3.bf16.msra.mxu0 %v625_v5  ;;  %610 = vmatpush3.bf16.msra.mxu1 %v625_v5 }
  0x30   :  { %576 = vmatprep.subr.bf16.mxu0 %v626_v7  ;;  %603 = vmatprep.subr.bf16.mxu1 %v626_v7 }
  0x33   :  { %577 = vmatpush3.bf16.msra.mxu0 %v626_v7  ;;  %611 = vmatpush3.bf16.msra.mxu1 %v626_v7 }
  0x34   :  { %578 = vmatprep.subr.bf16.mxu0 %v627_v8  ;;  %604 = vmatprep.subr.bf16.mxu1 %v627_v8 }
  0x37   :  { %579 = vmatpush3.bf16.msra.mxu0 %v627_v8  ;;  %612 = vmatpush3.bf16.msra.mxu1 %v627_v8 }
  0x38   :  { %580 = vmatprep.subr.bf16.mxu0 %v628_v9  ;;  %605 = vmatprep.subr.bf16.mxu1 %v628_v9 }
  0x3b   :  { %581 = vmatpush3.bf16.msra.mxu0 %v628_v9  ;;  %613 = vmatpush3.bf16.msra.mxu1 %v628_v9 }
  0x3e   :  { %583 = vmatmul.mubr.bf16.vlgmr.msra.gmra.mxu0 %v630_v10  ;;  %591 = vmatmul.mubr.bf16.vlgmr.msra.gmra.mxu1 %v634_v11 }
  0x3f   :  { %586 = vmatprep.mubr.bf16.mxu0 %v631_v12  ;;  %594 = vmatprep.mubr.bf16.mxu1 %v635_v13 }
  0x46   :  { %587 = vmatmul.mubr.bf16.gmra.mxu0 %v632_v14  ;;  %595 = vmatmul.mubr.bf16.gmra.mxu1 %v636_v15 }
  0xfe   :  { %v584_v16 = vpop.f32.mrf.mxu0  ;;  %v789_v17 = vpop.f32.mrf.mxu1 }
  0xff   :  { %v373_v33 = vmul.f32 %v584_v16, %v584_v16 }
 0x100   :  { %v207_v18 = vpop.f32.mrf.mxu0  ;;  %v791_v19 = vpop.f32.mrf.mxu1 }
 0x101   :  { %v371_v24 = vmul.f32 %v207_v18, %v207_v18 }
 0x102   :  { %v585_v20 = vpop.f32.mrf.mxu0  ;;  %v793_v21 = vpop.f32.mrf.mxu1 }
 0x103   :  { %v511_v22 = vpack.c.bf16 %v585_v20, %v584_v16  ;;  %v531_v23 = vpack.c.bf16 %v793_v21, %v789_v17  ;;  %v374_v38 = vmul.f32 %v585_v20, %v585_v20 }
 0x104   :  { %v210_v25 = vpop.f32.mrf.mxu0  ;;  %v242_v26 = vpop.f32.mrf.mxu1 }
 0x105   :  { %543 = vst [vmem:[#allocation7 + $0x8] sm:$0xff] %v511_v22   ;;  %v506_v27 = vpack.c.bf16 %v210_v25, %v207_v18  ;;  %v350_v28 = vadd.f32 %v210_v25, %v207_v18  ;;  %v372_v29 = vmul.f32 %v210_v25, %v210_v25  ;;  %547 = vst [vmem:[#allocation7 + $0x28] sm:$0xff] %v531_v23  }
 0x106   :  { %v526_v30 = vpack.c.bf16 %v242_v26, %v791_v19  ;;  %v588_v31 = vpop.f32.mrf.mxu0  ;;  %v798_v32 = vpop.f32.mrf.mxu1 }
 0x107   :  { %507 = vst [vmem:[#allocation7] sm:$0xff] %v506_v27   ;;  %v351_v34 = vadd.f32 %v584_v16, %v350_v28  ;;  %v387_v35 = vadd.f32 %v372_v29, %v371_v24  ;;  %v377_v55 = vmul.f32 %v588_v31, %v588_v31 }
 0x108   :  { %546 = vst [vmem:[#allocation7 + $0x20] sm:$0xff] %v526_v30   ;;  %v223_v36 = vpop.f32.mrf.mxu0  ;;  %v255_v37 = vpop.f32.mrf.mxu1 }
 0x109   :  { %v388_v39 = vadd.f32 %v387_v35, %v373_v33  ;;  %v352_v40 = vadd.f32 %v585_v20, %v351_v34  ;;  %v375_v44 = vmul.f32 %v223_v36, %v223_v36 }
 0x10a   :  { %v589_v41 = vpop.f32.mrf.mxu0  ;;  %v597_v42 = vpop.f32.mrf.mxu1 }
 0x10b   :  { %v353_v43 = vadd.f32 %v352_v40, %v223_v36  ;;  %v389_v45 = vadd.f32 %v388_v39, %v374_v38  ;;  %v521_v46 = vpack.c.bf16 %v589_v41, %v588_v31  ;;  %v541_v48 = vpack.c.bf16 %v597_v42, %v798_v32 }
 0x10c   :  { %v226_v47 = vpop.f32.mrf.mxu0  ;;  %v258_v49 = vpop.f32.mrf.mxu1  ;;  %v378_v58 = vmul.f32 %v589_v41, %v589_v41 }
 0x10d   :  { %v390_v50 = vadd.f32 %v389_v45, %v375_v44  ;;  %545 = vst [vmem:[#allocation7 + $0x18] sm:$0xff] %v521_v46   ;;  %v516_v51 = vpack.c.bf16 %v226_v47, %v223_v36  ;;  %v354_v52 = vadd.f32 %v353_v43, %v226_v47  ;;  %v376_v53 = vmul.f32 %v226_v47, %v226_v47 }
 0x10e   :  { %549 = vst [vmem:[#allocation7 + $0x38] sm:$0xff] %v541_v48   ;;  %v536_v54 = vpack.c.bf16 %v258_v49, %v255_v37 }
 0x10f   :  { %544 = vst [vmem:[#allocation7 + $0x10] sm:$0xff] %v516_v51   ;;  %v355_v56 = vadd.f32 %v588_v31, %v354_v52  ;;  %v391_v57 = vadd.f32 %v390_v50, %v376_v53 }
 0x110   :  { %548 = vst [vmem:[#allocation7 + $0x30] sm:$0xff] %v536_v54  }
 0x111   :  { %v356_v59 = vadd.f32 %v589_v41, %v355_v56  ;;  %v392_v60 = vadd.f32 %v391_v57, %v377_v55 }
 0x112   :  { %688 = shalt.err (!%p685_p0)
}
 0x113   :  { %421 = dma.vmem_to_hbm [thread:$0]  %s416_s1, 1024, %s827_s2, [#allocation4], %s746_s18, %s746_s18, %s747_s19   ;;  %v379_v61 = vmul.f32 %v791_v19, %v791_v19  ;;  %v393_v62 = vadd.f32 %v392_v60, %v378_v58  ;;  %v357_v63 = vadd.f32 %v356_v59, %v791_v19  ;;  %v380_v1 = vmul.f32 %v242_v26, %v242_v26 }
 0x114   :  { %v381_v3 = vmul.f32 %v789_v17, %v789_v17  ;;  %v382_v6 = vmul.f32 %v793_v21, %v793_v21  ;;  %v383_v10 = vmul.f32 %v255_v37, %v255_v37  ;;  %v384_v14 = vmul.f32 %v258_v49, %v258_v49  ;;  %s750_s2 = smov [#allocation8]   ;;  %s751_s5 = smov [#allocation10]  }
 0x115   :  { %v358_v0 = vadd.f32 %v357_v63, %v242_v26  ;;  %v394_v2 = vadd.f32 %v393_v62, %v379_v61  ;;  %v385_v15 = vmul.f32 %v798_v32, %v798_v32  ;;  %s428_s30 = sshll.u32 %s750_s2, 4  ;;  %s438_s6 = sshll.u32 %s751_s5, 4  ;;  %s429_s30 = int_to_ptr.vmem [resolvable:$true] %s428_s30  ;;  %s439_s6 = int_to_ptr.vmem [resolvable:$true] %s438_s6 }
 0x116   :  { %s697_s7 = scalar_lea.vmem %s429_s30, 128  ;;  %p702_p2 = scmp.lt.s32.totalorder %s429_s30, %s429_s30 }
 0x117   :  { %v359_v4 = vadd.f32 %v789_v17, %v358_v0  ;;  %v395_v5 = vadd.f32 %v394_v2, %v380_v1  ;;  %v386_v17 = vmul.f32 %v597_v42, %v597_v42  ;;  %p698_p1 = scmp.ne.s32.totalorder %s429_s30, %s697_s7  ;;  %p703_p3 = scmp.lt.s32.totalorder %s697_s7, %s697_s7 }
 0x119   :  { %v396_v7 = vadd.f32 %v395_v5, %v381_v3  ;;  %v360_v8 = vadd.f32 %v793_v21, %v359_v4  ;;  %p704_p4 = por %p703_p3, %p702_p2 }
 0x11b   :  { %v361_v9 = vadd.f32 %v360_v8, %v255_v37  ;;  %v397_v11 = vadd.f32 %v396_v7, %v382_v6  ;;  %p705_p5 = pnand %p704_p4, %p698_p1 }
 0x11d   :  { %v398_v12 = vadd.f32 %v397_v11, %v383_v10  ;;  %v362_v13 = vadd.f32 %v361_v9, %v258_v49 }
 0x11f   :  { %v363_v16 = vadd.f32 %v798_v32, %v362_v13  ;;  %v399_v18 = vadd.f32 %v398_v12, %v384_v14 }
 0x121   :  { %v364_v19 = vadd.f32 %v597_v42, %v363_v16  ;;  %v400_v20 = vadd.f32 %v399_v18, %v385_v15 }
 0x123   :  { %v365_v22 = vrot.slane %v364_v19, 4  ;;  %v401_v23 = vadd.f32 %v400_v20, %v386_v17 }
 0x125   :  { %v402_v24 = vrot.slane %v401_v23, 4  ;;  %v366_v25 = vadd.f32 %v365_v22, %v364_v19 }
 0x127   :  { %v367_v21 = vrot.slane %v366_v25, 2  ;;  %v403_v26 = vadd.f32 %v402_v24, %v401_v23 }
 0x129   :  { %v368_v27 = vadd.f32 %v367_v21, %v366_v25  ;;  %v404_v28 = vrot.slane %v403_v26, 2 }
 0x12b   :  { %v369_v29 = vrot.slane %v368_v27, 1  ;;  %v405_v30 = vadd.f32 %v404_v28, %v403_v26 }
 0x12d   :  { %v370_v31 = vadd.f32 %v369_v29, %v368_v27  ;;  %v406_v32 = vrot.slane %v405_v30, 1 }
 0x12f   :  { %408 = vst [vmem:[#allocation8] sm:$0xff] %v370_v31  ;;  %v407_v33 = vadd.f32 %v406_v32, %v405_v30 }
 0x130   :  { %708 = shalt.err (!%p705_p5)
}
 0x131   :  { %431 = dma.vmem_to_hbm [thread:$0]  %s429_s30, 128, %s828_s3, [#allocation9]   ;;  %409 = vst [vmem:[#allocation10] sm:$0xff] %v407_v33 }
 0x132   :  { %s717_s10 = scalar_lea.vmem %s439_s6, 128  ;;  %p722_p7 = scmp.lt.s32.totalorder %s439_s6, %s439_s6 }
 0x133   :  { %p718_p6 = scmp.ne.s32.totalorder %s439_s6, %s717_s10  ;;  %p723_p8 = scmp.lt.s32.totalorder %s717_s10, %s717_s10 }
 0x135   :  { %p724_p9 = por %p723_p8, %p722_p7 }
 0x137   :  { %p725_p10 = pnand %p724_p9, %p718_p6 }
 0x139   :  { %728 = shalt.err (!%p725_p10)
}
 0x13a   :  { %441 = dma.vmem_to_hbm [thread:$0]  %s439_s6, 128, %s829_s4, [#allocation9]  }
 0x13b   :  { %741 = dma.done.wait [#allocation4], 1024  }
 0x13c   :  { %742 = vsyncadd [#allocation4], 4294966272 }
 0x13d   :  { %743 = dma.done.wait [#allocation9], 256  }
 0x13e   :  { %744 = vsyncadd [#allocation9], 4294967040 }
 0x13f   :  { %451 = vsyncpa [#allocation3], 1 }
 0x140   :  { %452 = vsyncpa [#allocation6], 1 }
 0x141   :  { %453 = vsyncpa [#allocation4], 1 }
 0x142   :  { %454 = vsyncpa [#allocation9], 1 }

</bundles_post_ra>
